<compile_context>
chip_gen: v7x
topology: tpu7x:2x2x1
jax: 0.10.0
libtpu: 0.0.40
codegen_flags: <defaults>
</compile_context>

<pallas_src>
import functools

import jax
import jax.numpy as jnp
from jax.experimental import pallas as pl
from jax.experimental.pallas import tpu as pltpu


def _round_up(x, m):
    return ((x + m - 1) // m) * m


# ----------------------------- Pallas kernel -------------------------------

def _centralv_mlp_kernel(x_ref, w1s_ref, w1a_ref, b1_ref, w2_ref, b2_ref,
                         w3_ref, b3_ref, out_ref, *, n_agents):
    """Fused fc1 -> ReLU -> fc2 -> ReLU -> fc3 for one tile of timesteps.

    x_ref   : (TILE_T, D_shared) bf16   shared features [state|obs|last_act]
    w1s_ref : (D_shared, H) bf16        fc1 weights, shared-feature rows
    w1a_ref : (n_agents, H) f32         fc1 weights, agent-id one-hot rows
    b1_ref  : (1, H) f32
    w2_ref  : (H, H) bf16,  b2_ref: (1, H) f32
    w3_ref  : (1, H) f32 (fc3 weight as a row),  b3_ref: (1, 1) f32
    out_ref : (n_agents, TILE_T) f32    lane-dense: one agent per row
    """
    tile_t = x_ref.shape[0]
    h_dim = w2_ref.shape[0]

    # fc1 on the shared features: bf16 x bf16 -> f32 MXU matmul, computed once
    # per timestep (the agent-id one-hot block is folded in below).
    h_shared = jnp.dot(x_ref[...], w1s_ref[...],
                       preferred_element_type=jnp.float32) + b1_ref[...]

    # Per-agent fc1 row (eye(n_agents)[a] @ W1_agent == W1_agent[a]) + ReLU,
    # stacking all agents along the row axis so fc2 is a single long-M MXU
    # matmul instead of n_agents tiny (TILE_T, H) @ (H, H) dots.
    h1 = jnp.maximum(h_shared[None, :, :] + w1a_ref[...][:, None, :], 0.0)
    h1 = h1.reshape(n_agents * tile_t, h_dim).astype(jnp.bfloat16)

    h2 = jnp.maximum(
        jnp.dot(h1, w2_ref[...], preferred_element_type=jnp.float32)
        + b2_ref[...], 0.0)

    # fc3 (H -> 1): elementwise mul + lane reduce (VPU/XLU) instead of an N=1
    # MXU matmul; the (n_agents, TILE_T) result is stored lane-dense.
    q = jnp.sum(h2.reshape(n_agents, tile_t, h_dim) * w3_ref[...], axis=-1)
    out_ref[...] = (q + b3_ref[...]).astype(out_ref.dtype)


def centralv_mlp(x_shared, w1_shared, w1_agent, b1, w2, b2, w3_row, b3,
                 *, tile_t=1024):
    """Runs the fused MLP over the shared slab.

    x_shared: (T, D_shared) f32, T = bs*max_t.  Returns (T, n_agents) f32.
    """
    T, D = x_shared.shape
    n_agents, H = w1_agent.shape

    # Row-tile selection:
    #  * derived from the tile count so tail padding stays bounded,
    #  * multiple of 128 so the (n_agents, tile) output block is lane-dense,
    #  * >= 2 grid steps when there is enough work so v7x's two TensorCores
    #    both get a share of the "parallel" axis.
    n_tiles = pl.cdiv(T, tile_t)
    if n_tiles == 1 and T > 512:
        n_tiles = 2
    tile = _round_up(pl.cdiv(T, n_tiles), 128)
    T_pad = n_tiles * tile

    # bf16 operands for both MXU matmuls (full-rate MXU path); biases and the
    # elementwise fc3 path stay f32.
    x_shared = x_shared.astype(jnp.bfloat16)
    if T_pad != T:
        x_shared = jnp.pad(x_shared, ((0, T_pad - T), (0, 0)))
    w1_shared = w1_shared.astype(jnp.bfloat16)
    w2 = w2.astype(jnp.bfloat16)

    # Constant-index weight specs.  (On v7x with a very large D one could add
    # pipeline_mode=pl.Buffered(1) here to halve their VMEM footprint.)
    resident = lambda shape: pl.BlockSpec(shape, lambda i: (0, 0))
    kernel = functools.partial(_centralv_mlp_kernel, n_agents=n_agents)

    flops = (2 * T_pad * D * H                      # fc1 (shared part)
             + n_agents * T_pad * (2 * H * H)        # fc2
             + n_agents * T_pad * (4 * H))           # agent row + ReLUs + fc3
    bytes_accessed = (
        T_pad * D * 2                                # input slab (bf16)
        + n_agents * T_pad * 4                       # output (f32)
        + (D * H + H * H) * 2                        # bf16 weights
        + (n_agents * H + 3 * H + 1) * 4)            # f32 params

    out = pl.pallas_call(
        kernel,
        out_shape=jax.ShapeDtypeStruct((n_agents, T_pad), jnp.float32),
        grid=(n_tiles,),
        in_specs=[
            pl.BlockSpec((tile, D), lambda i: (i, 0)),   # x: tiled over rows
            resident((D, H)),                            # w1_shared (bf16)
            resident((n_agents, H)),                     # w1_agent (f32)
            resident((1, H)),                            # b1
            resident((H, H)),                            # w2 (bf16)
            resident((1, H)),                            # b2
            resident((1, H)),                            # w3 (row, f32)
            resident((1, 1)),                            # b3
        ],
        out_specs=pl.BlockSpec((n_agents, tile), lambda i: (0, i)),
        compiler_params=pltpu.CompilerParams(
            dimension_semantics=("parallel",),           # megacore on v7x
            vmem_limit_bytes=32 * 1024 * 1024),
        cost_estimate=pl.CostEstimate(
            flops=flops, transcendentals=0, bytes_accessed=bytes_accessed),
    )(x_shared, w1_shared, w1_agent, b1, w2, b2, w3_row, b3)

    # (n_agents, T_pad) lane-dense kernel output -> (T, n_agents); this tiny
    # transpose is a cheap XLA op outside the kernel.
    return out[:, :T].T


# ------------------------- input construction (glue) -----------------------

def build_shared_inputs(state, obs, actions_onehot):
    """Shared (per-timestep) part of CentralVCritic._build_inputs.

    state, flattened joint obs and last joint actions are identical for every
    agent; only the eye(n_agents) block differs, and that is folded into the
    kernel via W1's last n_agents rows.
    """
    bs, max_t, _ = state.shape
    obs_flat = obs.reshape(bs, max_t, -1)
    zeros_first = jnp.zeros_like(actions_onehot[:, 0:1])
    last_actions = jnp.concatenate(
        [zeros_first, actions_onehot[:, :-1]], axis=1).reshape(bs, max_t, -1)
    return jnp.concatenate([state, obs_flat, last_actions], axis=-1)


def centralv_forward(state, obs, actions_onehot, params, n_agents):
    """Forward pass equivalent to CentralVCritic.forward (non-image, t=None)."""
    w1_shared, w1_agent, b1, w2, b2, w3_row, b3 = params
    bs, max_t, _ = state.shape
    shared = build_shared_inputs(state, obs, actions_onehot)
    x = shared.reshape(bs * max_t, shared.shape[-1])
    q = centralv_mlp(x, w1_shared, w1_agent, b1, w2, b2, w3_row, b3)
    return q.reshape(bs, max_t, n_agents, 1)


# ------------------------------ parameter init ------------------------------

def init_linear(key, in_dim, out_dim):
    """PyTorch-style uniform(-1/sqrt(in), 1/sqrt(in)); weights returned as
    (in_dim, out_dim) i.e. already transposed for x @ W."""
    kw, kb = jax.random.split(key)
    bound = 1.0 / jnp.sqrt(jnp.float32(in_dim))
    w = jax.random.uniform(kw, (in_dim, out_dim), jnp.float32, -bound, bound)
    b = jax.random.uniform(kb, (1, out_dim), jnp.float32, -bound, bound)
    return w, b


# ----------------------------------- main -----------------------------------

if __name__ == "__main__":
    # Small config consistent with CentralVCritic (non-image scheme,
    # obs_individual_obs=True, obs_last_action=True):
    bs = 2
    max_t = 8
    n_agents = 3
    n_actions = 5
    state_vshape = 12
    obs_vshape = 6
    hidden_dim = 32
    shared_dim = state_vshape + n_agents * obs_vshape + n_agents * n_actions  # 45
    state_dim = shared_dim + n_agents                                          # 48

    key = jax.random.PRNGKey(0)
    k_state, k_obs, k_act, k1, k2, k3 = jax.random.split(key, 6)

    state = jax.random.normal(k_state, (bs, max_t, state_vshape), jnp.float32)
    obs = jax.random.normal(k_obs, (bs, max_t, n_agents, obs_vshape), jnp.float32)
    act_idx = jax.random.randint(k_act, (bs, max_t, n_agents), 0, n_actions)
    actions_onehot = jax.nn.one_hot(act_idx, n_actions, dtype=jnp.float32)

    w1, b1 = init_linear(k1, state_dim, hidden_dim)
    w2, b2 = init_linear(k2, hidden_dim, hidden_dim)
    w3, b3 = init_linear(k3, hidden_dim, 1)

    # Split fc1 weights into shared-feature rows and agent-id rows; fc3 weight
    # is passed as a (1, H) row for the VPU epilogue.
    params = (w1[:shared_dim], w1[shared_dim:], b1, w2, b2,
              w3.T, b3.reshape(1, 1))

    q = centralv_forward(state, obs, actions_onehot, params, n_agents)
    q = jax.block_until_ready(q)

    # Reference: mirrors the original PyTorch module (full per-agent concat
    # with eye(n_agents) and un-split W1), with the same bf16 rounding the
    # kernel applies to its MXU operands (shared features, W1 shared rows,
    # the h1 intermediate and W2).
    def bf16_round(a):
        return a.astype(jnp.bfloat16).astype(jnp.float32)

    shared = build_shared_inputs(state, obs, actions_onehot)
    shared_bf = bf16_round(shared)
    inp = jnp.broadcast_to(shared_bf[:, :, None, :],
                           (bs, max_t, n_agents, shared_dim))
    eye = jnp.broadcast_to(jnp.eye(n_agents, dtype=jnp.float32)[None, None],
                           (bs, max_t, n_agents, n_agents))
    x_full = jnp.concatenate([inp, eye], axis=-1).reshape(-1, state_dim)
    w1_mixed = jnp.concatenate(
        [bf16_round(w1[:shared_dim]), w1[shared_dim:]], axis=0)
    h = jnp.maximum(x_full @ w1_mixed + b1, 0.0)
    h = bf16_round(h)
    h = jnp.maximum(h @ bf16_round(w2) + b2, 0.0)
    q_ref = (h @ w3 + b3).reshape(bs, max_t, n_agents, 1)

    assert q.shape == (bs, max_t, n_agents, 1)
    err = float(jnp.max(jnp.abs(q - q_ref)))
    assert jnp.allclose(q, q_ref, atol=2e-2, rtol=2e-2), err

    print("KERNEL_OK")
</pallas_src>

<mosaic_0001>
module attributes {stable_mosaic.version = 11 : i64} {
  func.func @_centralv_mlp_kernel(%arg0: i32, %arg1: memref<128x45xbf16, #tpu.memory_space<vmem>>, %arg2: memref<45x32xbf16, #tpu.memory_space<vmem>>, %arg3: memref<3x32xf32, #tpu.memory_space<vmem>>, %arg4: memref<1x32xf32, #tpu.memory_space<vmem>>, %arg5: memref<32x32xbf16, #tpu.memory_space<vmem>>, %arg6: memref<1x32xf32, #tpu.memory_space<vmem>>, %arg7: memref<1x32xf32, #tpu.memory_space<vmem>>, %arg8: memref<1x1xf32, #tpu.memory_space<vmem>>, %arg9: memref<3x128xf32, #tpu.memory_space<vmem>>) attributes {dimension_semantics = [#tpu.dimension_semantics<parallel>], iteration_bounds = array<i64: 1>, scalar_prefetch = 0 : i64, scratch_operands = 0 : i64, tpu.core_type = #tpu.core_type<tc>, window_params = [{transform_indices = @transform_0, window_bounds = array<i64: 128, 45>}, {pipeline_mode = #tpu.pipeline_mode<synchronous>, transform_indices = @transform_1, window_bounds = array<i64: 45, 32>}, {pipeline_mode = #tpu.pipeline_mode<synchronous>, transform_indices = @transform_2, window_bounds = array<i64: 3, 32>}, {pipeline_mode = #tpu.pipeline_mode<synchronous>, transform_indices = @transform_3, window_bounds = array<i64: 1, 32>}, {pipeline_mode = #tpu.pipeline_mode<synchronous>, transform_indices = @transform_4, window_bounds = array<i64: 32, 32>}, {pipeline_mode = #tpu.pipeline_mode<synchronous>, transform_indices = @transform_5, window_bounds = array<i64: 1, 32>}, {pipeline_mode = #tpu.pipeline_mode<synchronous>, transform_indices = @transform_6, window_bounds = array<i64: 1, 32>}, {pipeline_mode = #tpu.pipeline_mode<synchronous>, transform_indices = @transform_7, window_bounds = array<i64: 1, 1>}, {transform_indices = @transform_8, window_bounds = array<i64: 3, 128>}]} {
    %c0 = arith.constant 0 : index
    %c0_0 = arith.constant 0 : index
    %0 = vector.load %arg1[%c0, %c0_0] : memref<128x45xbf16, #tpu.memory_space<vmem>>, vector<128x45xbf16>
    %c0_1 = arith.constant 0 : index
    %c0_2 = arith.constant 0 : index
    %1 = vector.load %arg2[%c0_1, %c0_2] : memref<45x32xbf16, #tpu.memory_space<vmem>>, vector<45x32xbf16>
    %cst = arith.constant dense<0.000000e+00> : vector<128x32xf32>
    %2 = tpu.matmul %0, %1, %cst {dimension_numbers = #tpu.dot_dimension_numbers<[1], [0], [0], [1], [0, 0, 1, 1], [], []>} : vector<128x45xbf16>, vector<45x32xbf16>, vector<128x32xf32> -> vector<128x32xf32>
    %c0_3 = arith.constant 0 : index
    %c0_4 = arith.constant 0 : index
    %3 = vector.load %arg4[%c0_3, %c0_4] : memref<1x32xf32, #tpu.memory_space<vmem>>, vector<1x32xf32>
    %4 = vector.broadcast %3 : vector<1x32xf32> to vector<128x32xf32>
    %5 = arith.addf %2, %4 : vector<128x32xf32>
    %6 = vector.shape_cast %5 : vector<128x32xf32> to vector<1x128x32xf32>
    %c0_5 = arith.constant 0 : index
    %c0_6 = arith.constant 0 : index
    %7 = vector.load %arg3[%c0_5, %c0_6] : memref<3x32xf32, #tpu.memory_space<vmem>>, vector<3x32xf32>
    %8 = vector.shape_cast %7 : vector<3x32xf32> to vector<3x1x32xf32>
    %9 = vector.broadcast %6 : vector<1x128x32xf32> to vector<3x128x32xf32>
    %10 = vector.broadcast %8 : vector<3x1x32xf32> to vector<3x128x32xf32>
    %11 = arith.addf %9, %10 : vector<3x128x32xf32>
    %cst_7 = arith.constant 0.000000e+00 : f32
    %12 = vector.broadcast %cst_7 : f32 to vector<3x128x32xf32>
    %13 = arith.maximumf %11, %12 : vector<3x128x32xf32>
    %14 = vector.shape_cast %13 : vector<3x128x32xf32> to vector<384x32xf32>
    %15 = arith.truncf %14 : vector<384x32xf32> to vector<384x32xbf16>
    %c0_8 = arith.constant 0 : index
    %c0_9 = arith.constant 0 : index
    %16 = vector.load %arg5[%c0_8, %c0_9] : memref<32x32xbf16, #tpu.memory_space<vmem>>, vector<32x32xbf16>
    %cst_10 = arith.constant dense<0.000000e+00> : vector<384x32xf32>
    %17 = tpu.matmul %15, %16, %cst_10 {dimension_numbers = #tpu.dot_dimension_numbers<[1], [0], [0], [1], [0, 0, 1, 1], [], []>} : vector<384x32xbf16>, vector<32x32xbf16>, vector<384x32xf32> -> vector<384x32xf32>
    %c0_11 = arith.constant 0 : index
    %c0_12 = arith.constant 0 : index
    %18 = vector.load %arg6[%c0_11, %c0_12] : memref<1x32xf32, #tpu.memory_space<vmem>>, vector<1x32xf32>
    %19 = vector.broadcast %18 : vector<1x32xf32> to vector<384x32xf32>
    %20 = arith.addf %17, %19 : vector<384x32xf32>
    %cst_13 = arith.constant 0.000000e+00 : f32
    %21 = vector.broadcast %cst_13 : f32 to vector<384x32xf32>
    %22 = arith.maximumf %20, %21 : vector<384x32xf32>
    %23 = vector.shape_cast %22 : vector<384x32xf32> to vector<3x128x32xf32>
    %c0_14 = arith.constant 0 : index
    %c0_15 = arith.constant 0 : index
    %24 = vector.load %arg7[%c0_14, %c0_15] : memref<1x32xf32, #tpu.memory_space<vmem>>, vector<1x32xf32>
    %25 = vector.shape_cast %24 : vector<1x32xf32> to vector<1x1x32xf32>
    %26 = vector.broadcast %25 : vector<1x1x32xf32> to vector<3x128x32xf32>
    %27 = arith.mulf %23, %26 : vector<3x128x32xf32>
    %cst_16 = arith.constant dense<0.000000e+00> : vector<3x128xf32>
    %28 = vector.multi_reduction <add>, %27, %cst_16 [2] : vector<3x128x32xf32> to vector<3x128xf32>
    %c0_17 = arith.constant 0 : index
    %c0_18 = arith.constant 0 : index
    %29 = vector.load %arg8[%c0_17, %c0_18] : memref<1x1xf32, #tpu.memory_space<vmem>>, vector<1x1xf32>
    %30 = vector.broadcast %29 : vector<1x1xf32> to vector<3x128xf32>
    %31 = arith.addf %28, %30 : vector<3x128xf32>
    %c0_19 = arith.constant 0 : index
    %c0_20 = arith.constant 0 : index
    %32 = vector.load %arg9[%c0_19, %c0_20] : memref<3x128xf32, #tpu.memory_space<vmem>>, vector<3x128xf32>
    tpu.vector_store %arg9[%c0_19, %c0_20], %31 {strides = array<i32>} : memref<3x128xf32, #tpu.memory_space<vmem>>, vector<3x128xf32>,
    return
  }
  func.func @transform_0(%arg0: i32) -> (i32, i32) {
    %c0_i32 = arith.constant 0 : i32
    %c0_i32_0 = arith.constant 0 : i32
    return %arg0, %c0_i32 : i32, i32
  }
  func.func @transform_1(%arg0: i32) -> (i32, i32) {
    %c0_i32 = arith.constant 0 : i32
    %c0_i32_0 = arith.constant 0 : i32
    %c0_i32_1 = arith.constant 0 : i32
    return %c0_i32, %c0_i32_0 : i32, i32
  }
  func.func @transform_2(%arg0: i32) -> (i32, i32) {
    %c0_i32 = arith.constant 0 : i32
    %c0_i32_0 = arith.constant 0 : i32
    %c0_i32_1 = arith.constant 0 : i32
    return %c0_i32, %c0_i32_0 : i32, i32
  }
  func.func @transform_3(%arg0: i32) -> (i32, i32) {
    %c0_i32 = arith.constant 0 : i32
    %c0_i32_0 = arith.constant 0 : i32
    %c0_i32_1 = arith.constant 0 : i32
    return %c0_i32, %c0_i32_0 : i32, i32
  }
  func.func @transform_4(%arg0: i32) -> (i32, i32) {
    %c0_i32 = arith.constant 0 : i32
    %c0_i32_0 = arith.constant 0 : i32
    %c0_i32_1 = arith.constant 0 : i32
    return %c0_i32, %c0_i32_0 : i32, i32
  }
  func.func @transform_5(%arg0: i32) -> (i32, i32) {
    %c0_i32 = arith.constant 0 : i32
    %c0_i32_0 = arith.constant 0 : i32
    %c0_i32_1 = arith.constant 0 : i32
    return %c0_i32, %c0_i32_0 : i32, i32
  }
  func.func @transform_6(%arg0: i32) -> (i32, i32) {
    %c0_i32 = arith.constant 0 : i32
    %c0_i32_0 = arith.constant 0 : i32
    %c0_i32_1 = arith.constant 0 : i32
    return %c0_i32, %c0_i32_0 : i32, i32
  }
  func.func @transform_7(%arg0: i32) -> (i32, i32) {
    %c0_i32 = arith.constant 0 : i32
    %c0_i32_0 = arith.constant 0 : i32
    %c0_i32_1 = arith.constant 0 : i32
    return %c0_i32, %c0_i32_0 : i32, i32
  }
  func.func @transform_8(%arg0: i32) -> (i32, i32) {
    %c0_i32 = arith.constant 0 : i32
    %c0_i32_0 = arith.constant 0 : i32
    return %c0_i32, %arg0 : i32, i32
  }
}

</mosaic_0001>

<bundles_post_ra>
// kernel: tpu_custom_call.1
= control target key start
LH: loop header
LB: loop body
LE: loop exit
PB: predicated region body
PF: predicated region fallthrough
CT: control target
= control target key end

     0   :  { %s2248_s0 = inlined_call_operand.vmem [shape: bf16[128,45], index: 0, kind: input, shape index: {}]   ;;  %s2249_s1 = inlined_call_operand.vmem [shape: bf16[45,32], index: 1, kind: input, shape index: {}]   ;;  %s2250_s2 = inlined_call_operand.vmem [shape: f32[3,32], index: 2, kind: input, shape index: {}]   ;;  %s2251_s3 = inlined_call_operand.vmem [shape: f32[1,32], index: 3, kind: input, shape index: {}]   ;;  %s2252_s4 = inlined_call_operand.vmem [shape: bf16[32,32], index: 4, kind: input, shape index: {}]   ;;  %s2253_s5 = inlined_call_operand.vmem [shape: f32[1,32], index: 5, kind: input, shape index: {}]   ;;  %s2254_s6 = inlined_call_operand.vmem [shape: f32[1,32], index: 6, kind: input, shape index: {}]   ;;  %s2255_s7 = inlined_call_operand.<no memory space> [shape: f32[1,1], index: 7, kind: input, shape index: {}]   ;;  %s2256_s8 = inlined_call_operand.hbm [shape: f32[3,128], index: 8, kind: output, shape index: {}]  }
   0x1   :  { %v13_v0 = vstv %s2255_s7 }
   0x2   :  { %14 = vst [vmem:[#allocation2] sm:$0x1] %v13_v0 }
   0x3   :  { %v1542_v1 = vld [vmem:[%s2249_s1] sm:$0xff]   ;;  %vm144_vm0 = vcmask 1045504   ;;  %v1543_v2 = vld [vmem:[%s2249_s1 + $0x8] sm:$0xff]   ;;  %vm145_vm1 = vcmask 1046528   ;;  %v1544_v3 = vld [vmem:[%s2249_s1 + $0x10] sm:$0x7f]  }
   0x4   :  { %1458 = vmatprep.subr.bf16.mxu0 %v1542_v1  ;;  %v1545_v4 = vld [vmem:[%s2248_s0] sm:$0xff]   ;;  %v1579_v5 = vmov 65535   ;;  %vm119_vm2 = vcmask 367616   ;;  %v1546_v9 = vld [vmem:[%s2248_s0 + $0x8] sm:$0xff]   ;;  %v1547_v10 = vld [vmem:[%s2248_s0 + $0x10] sm:$0xff]  }
   0x5   :  { %1459 = vmatpush3.bf16.msra.mxu0 %v1542_v1  ;;  %v146_v6 = vsel %vm144_vm0, 4294967295, %v1579_v5  ;;  %1464 = vmatprep.mubr.msk.bf16.mxu0 %vm119_vm2, %v1545_v4 }
   0x6   :  { %1460 = vmatprep.subr.bf16.mxu0 %v1543_v2  ;;  %v147_v7 = vsel %vm145_vm1, %v146_v6, 0 }
   0x7   :  { %v149_v8 = vand.u32 %v1544_v3, %v147_v7 }
   0x9   :  { %1461 = vmatpush3.bf16.msra.mxu0 %v1543_v2 }
   0xa   :  { %1462 = vmatprep.subr.bf16.mxu0 %v149_v8 }
   0xd   :  { %1463 = vmatpush3.bf16.msra.mxu0 %v149_v8 }
   0xe   :  { %15 = vsyncpa [#allocation4], 0  ;;  %v1548_v11 = vld [vmem:[%s2248_s0 + $0x18] sm:$0xff]   ;;  %v1549_v12 = vld [vmem:[%s2248_s0 + $0x20] sm:$0xff]   ;;  %v1580_v19 = vmov 0   ;;  %v261_v22 = vlaneseq  ;;  %vm431_vm3 = vcmask 261120  }
   0xf   :  { %v1550_v13 = vld [vmem:[%s2248_s0 + $0x28] sm:$0xff]   ;;  %v1551_v14 = vld [vmem:[%s2248_s0 + $0x30] sm:$0xff]   ;;  %v1552_v15 = vld [vmem:[%s2248_s0 + $0x38] sm:$0xff]   ;;  %1540 = vset.pattern.permute.xlu1 %v1580_v19  ;;  %1541 = vset.pattern.permute.xlu0 %v1580_v19  ;;  %v1581_v20 = vmov 1966171168   ;;  %vm1093_vm4 = vcmask 130112  }
  0x10   :  { %1465 = vmatmul.mubr.msk.bf16.vlgmr.msra.gmra.mrb[0].mxu0 %vm119_vm2, %v1546_v9  ;;  %v1553_v16 = vld [vmem:[%s2252_s4] sm:$0xff]   ;;  %v1554_v17 = vld [vmem:[%s2252_s4 + $0x8] sm:$0xff]   ;;  %v259_v21 = vunpack.c.l.s4 %v1581_v20  ;;  %v1679_v24 = vshrl.u32 %v261_v22, 7  ;;  %vm1100_vm5 = vcmask 195712   ;;  %vm1107_vm6 = vcmask 261312  }
  0x11   :  { %1468 = vmatprep.mubr.msk.bf16.mxu0 %vm119_vm2, %v1547_v10  ;;  %1480 = vmatprep.subr.bf16.mxu0 %v1553_v16  ;;  %v1420_v18 = vld [vmem:[#allocation2] ss:$0 sm:$0xff]  ;;  %vm1114_vm7 = vcmask 326912   ;;  %vm1121_vm8 = vcmask 392512   ;;  %vm1128_vm9 = vcmask 458112   ;;  %vm1135_vm10 = vcmask 523712  }
  0x12   :  { %1532 = vmatprep.subr.bf16.mxu1 %v1553_v16  ;;  %1481 = vmatpush3.bf16.msra.mxu0 %v1553_v16  ;;  %v260_v23 = vunpack.c.0.s8 %v259_v21  ;;  %v1391_v26 = vld.sshfl [vmem:[%s2250_s2] sm:$0x13 pattern:$0x75316420]  ;;  %v275_v31 = vsub.s32 0, %v1679_v24  ;;  %vm1142_vm11 = vcmask 589312  }
  0x13   :  { %1534 = vmatpush3.bf16.msra.mxu1 %v1553_v16  ;;  %1482 = vmatprep.subr.bf16.mxu0 %v1554_v17  ;;  %v257_v27 = vcombine.high %v1391_v26, %v1391_v26  ;;  %v1689_v32 = vld [vmem:[%s2251_s3] ss:$0 sm:$0xff]  ;;  %vm1149_vm12 = vcmask 654912   ;;  %vm1156_vm13 = vcmask 720512   ;;  %vm1163_vm14 = vcmask 786112  }
  0x14   :  { %1533 = vmatprep.subr.bf16.mxu1 %v1554_v17  ;;  %983 = vperm.xlu1 %1540, %v1420_v18   ;;  %v263_v25 = vsub.s32 %v260_v23, %v1679_v24  ;;  %vm1170_vm15 = vcmask 851712   ;;  %vm1177_vm0 = vcmask 917312   ;;  %vm1184_vm1 = vcmask 982912  }
  0x16   :  { %1483 = vmatpush3.bf16.msra.mxu0 %v1554_v17  ;;  %v264_v28 = vrot.slane %v1391_v26, %v263_v25  ;;  %v271_v29 = vrot.slane %v257_v27, %v263_v25 }
  0x17   :  { %1535 = vmatpush3.bf16.msra.mxu1 %v1554_v17 }
  0x18   :  { %1469 = vmatmul.mubr.msk.bf16.gmra.mrb[4].mxu0 %vm119_vm2, %v1548_v11  ;;  %v272_v30 = vcombine.high %v264_v28, %v264_v28  ;;  %v1691_v33 = vrot.slane %v264_v28, %v275_v31  ;;  %v1693_v34 = vrot.slane %v271_v29, %v275_v31 }
  0x19   :  { %1472 = vmatprep.mubr.msk.bf16.mxu0 %vm119_vm2, %v1549_v12 }
  0x1a   :  { %v1695_v35 = vrot.slane %v272_v30, %v275_v31 }
  0x20   :  { %1473 = vmatmul.mubr.msk.bf16.gmra.mrb[8].mxu0 %vm119_vm2, %v1550_v13 }
  0x21   :  { %1476 = vmatprep.mubr.msk.bf16.mxu0 %vm119_vm2, %v1551_v14 }
  0x28   :  { %1477 = vmatmul.mubr.msk.bf16.gmra.mrb[12].mxu0 %vm119_vm2, %v1552_v15  ;;  %vm1191_vm2 = vcmask 1048512  }
  0xe3   :  { %v1466_v36 = vpop.f32.mrb[0].mxu0 }
  0xe4   :  { %v194_v37 = vadd.f32 %v1466_v36, %v1689_v32  ;;  %v185_v38 = vpop.f32.mrb[1].mxu0 }
  0xe5   :  { %v186_v39 = vadd.f32 %v1689_v32, %v185_v38  ;;  %v1467_v40 = vpop.f32.mrb[2].mxu0 }
  0xe6   :  { %v290_v41 = vadd.f32 %v1691_v33, %v194_v37  ;;  %v306_v42 = vadd.f32 %v1693_v34, %v194_v37  ;;  %v322_v43 = vadd.f32 %v1695_v35, %v194_v37  ;;  %v197_v44 = vadd.f32 %v1467_v40, %v1689_v32  ;;  %v188_v45 = vpop.f32.mrb[3].mxu0 }
  0xe7   :  { %v288_v46 = vadd.f32 %v1691_v33, %v186_v39  ;;  %v304_v47 = vadd.f32 %v1693_v34, %v186_v39  ;;  %v189_v48 = vadd.f32 %v1689_v32, %v188_v45  ;;  %v320_v49 = vadd.f32 %v1695_v35, %v186_v39 }
  0xe8   :  { %v291_v50 = vadd.f32 %v1691_v33, %v197_v44  ;;  %v338_v51 = vmax.f32 %v290_v41, 0.0  ;;  %v354_v52 = vmax.f32 %v306_v42, 0.0  ;;  %v370_v53 = vmax.f32 %v322_v43, 0.0 }
  0xe9   :  { %v307_v54 = vadd.f32 %v1693_v34, %v197_v44  ;;  %v323_v55 = vadd.f32 %v1695_v35, %v197_v44  ;;  %v289_v57 = vadd.f32 %v1691_v33, %v189_v48  ;;  %v305_v58 = vadd.f32 %v1693_v34, %v189_v48 }
  0xea   :  { %v339_v56 = vmax.f32 %v291_v50, 0.0  ;;  %v336_v59 = vmax.f32 %v288_v46, 0.0  ;;  %v352_v60 = vmax.f32 %v304_v47, 0.0  ;;  %v321_v62 = vadd.f32 %v1695_v35, %v189_v48 }
  0xeb   :  { %v355_v61 = vmax.f32 %v307_v54, 0.0  ;;  %v1470_v63 = vpop.f32.mrb[4].mxu0  ;;  %v371_v0 = vmax.f32 %v323_v55, 0.0  ;;  %v337_v2 = vmax.f32 %v289_v57, 0.0  ;;  %v353_v3 = vmax.f32 %v305_v58, 0.0 }
  0xec   :  { %v385_v1 = vpack.c.bf16 %v339_v56, %v338_v51  ;;  %v201_v4 = vpop.f32.mrb[5].mxu0  ;;  %v369_v5 = vmax.f32 %v321_v62, 0.0  ;;  %v210_v6 = vadd.f32 %v1470_v63, %v1689_v32  ;;  %v368_v25 = vmax.f32 %v320_v49, 0.0 }
  0xed   :  { %v202_v7 = vadd.f32 %v1689_v32, %v201_v4  ;;  %v1471_v8 = vpop.f32.mrb[6].mxu0  ;;  %v1715_v9 = vpack.c.bf16 %v355_v61, %v354_v52  ;;  %v384_v12 = vpack.c.bf16 %v337_v2, %v336_v59  ;;  %v1718_v13 = vpack.c.bf16 %v353_v3, %v352_v60 }
  0xee   :  { %v213_v10 = vadd.f32 %v1471_v8, %v1689_v32  ;;  %v204_v11 = vpop.f32.mrb[7].mxu0  ;;  %v1720_v14 = vpack.c.bf16 %v371_v0, %v370_v53  ;;  %v294_v15 = vadd.f32 %v1691_v33, %v210_v6  ;;  %v1724_v16 = vadd.f32 %v1693_v34, %v210_v6 }
  0xef   :  { %v1727_v17 = vadd.f32 %v1695_v35, %v210_v6  ;;  %v292_v18 = vadd.f32 %v1691_v33, %v202_v7  ;;  %v308_v19 = vadd.f32 %v1693_v34, %v202_v7  ;;  %v1732_v20 = vadd.f32 %v1695_v35, %v202_v7  ;;  %1484 = vmatprep.mubr.msk.bf16.mxu0 %vm431_vm3, %v384_v12 }
  0xf0   :  { %v295_v21 = vadd.f32 %v1691_v33, %v213_v10  ;;  %v311_v23 = vadd.f32 %v1693_v34, %v213_v10  ;;  %v342_v26 = vmax.f32 %v294_v15, 0.0  ;;  %1485 = vmatmul.mubr.msk.bf16.vlgmr.msra.gmra.mrb[16].mxu0 %vm431_vm3, %v385_v1  ;;  %v358_v27 = vmax.f32 %v1724_v16, 0.0 }
  0xf1   :  { %v374_v28 = vmax.f32 %v1727_v17, 0.0  ;;  %v340_v29 = vmax.f32 %v292_v18, 0.0  ;;  %v356_v31 = vmax.f32 %v308_v19, 0.0  ;;  %v1741_v36 = vadd.f32 %v1695_v35, %v213_v10 }
  0xf2   :  { %v343_v30 = vmax.f32 %v295_v21, 0.0  ;;  %v205_v37 = vadd.f32 %v1689_v32, %v204_v11  ;;  %v1744_v39 = vpack.c.bf16 %v369_v5, %v368_v25  ;;  %v372_v40 = vmax.f32 %v1732_v20, 0.0 }
  0xf3   :  { %v1474_v38 = vpop.f32.mrb[8].mxu0  ;;  %v359_v41 = vmax.f32 %v311_v23, 0.0  ;;  %v375_v55 = vmax.f32 %v1741_v36, 0.0  ;;  %v1837_v36 = vld [vmem:[%s2254_s6] ss:$0 sm:$0xff] }
  0xf4   :  { %v226_v42 = vadd.f32 %v1474_v38, %v1689_v32  ;;  %v217_v43 = vpop.f32.mrb[9].mxu0  ;;  %v387_v44 = vpack.c.bf16 %v343_v30, %v342_v26  ;;  %v293_v45 = vadd.f32 %v1691_v33, %v205_v37  ;;  %v309_v46 = vadd.f32 %v1693_v34, %v205_v37 }
  0xf5   :  { %v1751_v47 = vadd.f32 %v1695_v35, %v205_v37  ;;  %v218_v48 = vadd.f32 %v1689_v32, %v217_v43  ;;  %v1475_v49 = vpop.f32.mrb[10].mxu0  ;;  %v395_v30 = vpack.c.bf16 %v359_v41, %v358_v27 }
  0xf6   :  { %v298_v50 = vadd.f32 %v1691_v33, %v226_v42  ;;  %v1756_v51 = vadd.f32 %v1693_v34, %v226_v42  ;;  %v1759_v52 = vadd.f32 %v1695_v35, %v226_v42  ;;  %v229_v53 = vadd.f32 %v1475_v49, %v1689_v32  ;;  %v220_v54 = vpop.f32.mrb[11].mxu0 }
  0xf7   :  { %v341_v56 = vmax.f32 %v293_v45, 0.0  ;;  %v357_v57 = vmax.f32 %v309_v46, 0.0  ;;  %v296_v58 = vadd.f32 %v1691_v33, %v218_v48  ;;  %v373_v59 = vmax.f32 %v1751_v47, 0.0 }
  0xf8   :  { %v346_v60 = vmax.f32 %v298_v50, 0.0  ;;  %v362_v61 = vmax.f32 %v1756_v51, 0.0  ;;  %v312_v62 = vadd.f32 %v1693_v34, %v218_v48  ;;  %v378_v63 = vmax.f32 %v1759_v52, 0.0 }
  0xf9   :  { %v328_v0 = vadd.f32 %v1695_v35, %v218_v48  ;;  %v299_v1 = vadd.f32 %v1691_v33, %v229_v53  ;;  %v315_v2 = vadd.f32 %v1693_v34, %v229_v53  ;;  %v344_v3 = vmax.f32 %v296_v58, 0.0 }
  0xfa   :  { %v331_v4 = vadd.f32 %v1695_v35, %v229_v53  ;;  %v221_v5 = vadd.f32 %v1689_v32, %v220_v54  ;;  %v386_v6 = vpack.c.bf16 %v341_v56, %v340_v29  ;;  %v360_v7 = vmax.f32 %v312_v62, 0.0 }
  0xfb   :  { %v376_v8 = vmax.f32 %v328_v0, 0.0  ;;  %v347_v10 = vmax.f32 %v299_v1, 0.0  ;;  %v1478_v11 = vpop.f32.mrb[12].mxu0  ;;  %v1773_v12 = vpack.c.bf16 %v357_v57, %v356_v31  ;;  %v363_v15 = vmax.f32 %v315_v2, 0.0 }
  0xfc   :  { %v297_v16 = vadd.f32 %v1691_v33, %v221_v5  ;;  %v313_v18 = vadd.f32 %v1693_v34, %v221_v5  ;;  %v329_v19 = vadd.f32 %v1695_v35, %v221_v5  ;;  %1488 = vmatprep.mubr.msk.bf16.mxu0 %vm431_vm3, %v386_v6  ;;  %v233_v21 = vpop.f32.mrb[13].mxu0  ;;  %v242_v23 = vadd.f32 %v1478_v11, %v1689_v32 }
  0xfd   :  { %1489 = vmatmul.mubr.msk.bf16.gmra.mrb[20].mxu0 %vm431_vm3, %v387_v44  ;;  %v234_v25 = vadd.f32 %v1689_v32, %v233_v21  ;;  %v1479_v26 = vpop.f32.mrb[14].mxu0  ;;  %v389_v29 = vpack.c.bf16 %v347_v10, %v346_v60  ;;  %v379_v31 = vmax.f32 %v331_v4, 0.0  ;;  %v397_v4 = vpack.c.bf16 %v363_v15, %v362_v61 }
  0xfe   :  { %v345_v37 = vmax.f32 %v297_v16, 0.0  ;;  %v361_v38 = vmax.f32 %v313_v18, 0.0  ;;  %v245_v42 = vadd.f32 %v1479_v26, %v1689_v32  ;;  %v236_v43 = vpop.f32.mrb[15].mxu0  ;;  %v302_v45 = vadd.f32 %v1691_v33, %v242_v23 }
  0xff   :  { %v318_v46 = vadd.f32 %v1693_v34, %v242_v23  ;;  %v334_v47 = vadd.f32 %v1695_v35, %v242_v23  ;;  %v316_v44 = vadd.f32 %v1693_v34, %v234_v25  ;;  %v377_v48 = vmax.f32 %v329_v19, 0.0 }
 0x100   :  { %v303_v49 = vadd.f32 %v1691_v33, %v245_v42  ;;  %v319_v50 = vadd.f32 %v1693_v34, %v245_v42  ;;  %v335_v27 = vadd.f32 %v1695_v35, %v245_v42  ;;  %v350_v41 = vmax.f32 %v302_v45, 0.0 }
 0x101   :  { %v366_v51 = vmax.f32 %v318_v46, 0.0  ;;  %v382_v52 = vmax.f32 %v334_v47, 0.0  ;;  %v332_v53 = vadd.f32 %v1695_v35, %v234_v25  ;;  %v364_v54 = vmax.f32 %v316_v44, 0.0 }
 0x102   :  { %v351_v56 = vmax.f32 %v303_v49, 0.0  ;;  %v367_v57 = vmax.f32 %v319_v50, 0.0  ;;  %v383_v58 = vmax.f32 %v335_v27, 0.0  ;;  %v237_v60 = vadd.f32 %v1689_v32, %v236_v43 }
 0x103   :  { %v388_v62 = vpack.c.bf16 %v345_v37, %v344_v3  ;;  %v300_v0 = vadd.f32 %v1691_v33, %v234_v25  ;;  %v396_v1 = vpack.c.bf16 %v361_v38, %v360_v7  ;;  %v402_v6 = vpack.c.bf16 %v373_v59, %v372_v40 }
 0x104   :  { %v391_v2 = vpack.c.bf16 %v351_v56, %v350_v41  ;;  %v399_v5 = vpack.c.bf16 %v367_v57, %v366_v51  ;;  %v380_v10 = vmax.f32 %v332_v53, 0.0  ;;  %v317_v11 = vadd.f32 %v1693_v34, %v237_v60 }
 0x105   :  { %v333_v16 = vadd.f32 %v1695_v35, %v237_v60  ;;  %1492 = vmatprep.mubr.msk.bf16.mxu0 %vm431_vm3, %v388_v62  ;;  %v301_v18 = vadd.f32 %v1691_v33, %v237_v60  ;;  %v403_v32 = vpack.c.bf16 %v375_v55, %v374_v28  ;;  %v404_v61 = vpack.c.bf16 %v377_v48, %v376_v8  ;;  %v1830_v33 = vld [vmem:[%s2253_s5] ss:$0 sm:$0xff]  ;;  %s1582_s5 = smov [#allocation3]  }
 0x106   :  { %1493 = vmatmul.mubr.msk.bf16.gmra.mrb[24].mxu0 %vm431_vm3, %v389_v29  ;;  %v405_v3 = vpack.c.bf16 %v379_v31, %v378_v63  ;;  %v407_v20 = vpack.c.bf16 %v383_v58, %v382_v52  ;;  %v365_v40 = vmax.f32 %v317_v11, 0.0  ;;  %v348_v7 = vmax.f32 %v300_v0, 0.0  ;;  %s1363_s6 = sshll.u32 %s1582_s5, 4  ;;  %s1364_s6 = int_to_ptr.vmem [resolvable:$true] %s1363_s6 }
 0x107   :  { %v381_v59 = vmax.f32 %v333_v16, 0.0  ;;  %v349_v34 = vmax.f32 %v301_v18, 0.0  ;;  %s1555_s13 = scalar_lea.vmem %s1364_s6, 64  ;;  %p1560_p1 = scmp.lt.s32.totalorder %s1364_s6, %s1364_s6 }
 0x108   :  { %v398_v35 = vpack.c.bf16 %v365_v40, %v364_v54  ;;  %p1556_p0 = scmp.ne.s32.totalorder %s1364_s6, %s1555_s13  ;;  %p1561_p2 = scmp.lt.s32.totalorder %s1555_s13, %s1555_s13 }
 0x109   :  { %v390_v15 = vpack.c.bf16 %v349_v34, %v348_v7  ;;  %v406_v19 = vpack.c.bf16 %v381_v59, %v380_v10 }
 0x10a   :  { %p1562_p3 = por %p1561_p2, %p1560_p1 }
 0x10b   :  { %1496 = vmatprep.mubr.msk.bf16.mxu1 %vm431_vm3, %v390_v15 }
 0x10c   :  { %1497 = vmatmul.mubr.msk.bf16.vlgmr.msra.gmra.mrb[0].mxu1 %vm431_vm3, %v391_v2  ;;  %p1563_p4 = pnand %p1562_p3, %p1556_p0 }
 0x10d   :  { %1500 = vmatprep.mubr.msk.bf16.mxu1 %vm431_vm3, %v1718_v13 }
 0x114   :  { %1501 = vmatmul.mubr.msk.bf16.gmra.mrb[4].mxu1 %vm431_vm3, %v1715_v9 }
 0x115   :  { %1504 = vmatprep.mubr.msk.bf16.mxu1 %vm431_vm3, %v1773_v12 }
 0x11c   :  { %1505 = vmatmul.mubr.msk.bf16.gmra.mrb[8].mxu1 %vm431_vm3, %v395_v30 }
 0x11d   :  { %1508 = vmatprep.mubr.msk.bf16.mxu1 %vm431_vm3, %v396_v1 }
 0x124   :  { %1509 = vmatmul.mubr.msk.bf16.gmra.mrb[12].mxu1 %vm431_vm3, %v397_v4 }
 0x125   :  { %1512 = vmatprep.mubr.msk.bf16.mxu1 %vm431_vm3, %v398_v35 }
 0x12c   :  { %1513 = vmatmul.mubr.msk.bf16.gmra.mrb[16].mxu1 %vm431_vm3, %v399_v5 }
 0x12d   :  { %1516 = vmatprep.mubr.msk.bf16.mxu1 %vm431_vm3, %v1744_v39 }
 0x134   :  { %1517 = vmatmul.mubr.msk.bf16.gmra.mrb[20].mxu1 %vm431_vm3, %v1720_v14 }
 0x135   :  { %1520 = vmatprep.mubr.msk.bf16.mxu1 %vm431_vm3, %v402_v6 }
 0x13c   :  { %1521 = vmatmul.mubr.msk.bf16.gmra.mrb[24].mxu1 %vm431_vm3, %v403_v32 }
 0x13d   :  { %1524 = vmatprep.mubr.msk.bf16.mxu1 %vm431_vm3, %v404_v61 }
 0x144   :  { %1525 = vmatmul.mubr.msk.bf16.gmra.mrb[28].mxu1 %vm431_vm3, %v405_v3 }
 0x145   :  { %1528 = vmatprep.mubr.msk.bf16.mxu1 %vm431_vm3, %v406_v19 }
 0x14c   :  { %1529 = vmatmul.mubr.msk.bf16.gmra.mrb[32].mxu1 %vm431_vm3, %v407_v20 }
 0x1c3   :  { %v1486_v9 = vpop.f32.mrb[16].mxu0 }
 0x1c4   :  { %v547_v13 = vadd.f32 %v1486_v9, %v1830_v33  ;;  %v538_v14 = vpop.f32.mrb[17].mxu0 }
 0x1c5   :  { %v539_v17 = vadd.f32 %v1830_v33, %v538_v14  ;;  %v1487_v28 = vpop.f32.mrb[18].mxu0 }
 0x1c6   :  { %v731_v39 = vmax.f32 %v547_v13, 0.0  ;;  %v550_v55 = vadd.f32 %v1487_v28, %v1830_v33  ;;  %v541_v63 = vpop.f32.mrb[19].mxu0 }
 0x1c7   :  { %v729_v8 = vmax.f32 %v539_v17, 0.0  ;;  %v542_v12 = vadd.f32 %v1830_v33, %v541_v63 }
 0x1c8   :  { %v732_v21 = vmax.f32 %v550_v55, 0.0  ;;  %v786_v23 = vmul.f32 %v1837_v36, %v731_v39 }
 0x1c9   :  { %v730_v25 = vmax.f32 %v542_v12, 0.0  ;;  %v784_v26 = vmul.f32 %v1837_v36, %v729_v8 }
 0x1ca   :  { %v838_v29 = vsel %vm431_vm3, %v786_v23, 0.0  ;;  %v787_v30 = vmul.f32 %v1837_v36, %v732_v21 }
 0x1cb   :  { %839 = vadd.xlane.f32.xlu1 %v838_v29  ;;  %v832_v31 = vsel %vm431_vm3, %v784_v26, 0.0  ;;  %v785_v37 = vmul.f32 %v1837_v36, %v730_v25 }
 0x1cc   :  { %833 = vadd.xlane.f32.xlu0 %v832_v31  ;;  %v841_v38 = vsel %vm431_vm3, %v787_v30, 0.0 }
 0x1cd   :  { %v835_v43 = vsel %vm431_vm3, %v785_v37, 0.0 }
 0x1cf   :  { %842 = vadd.xlane.f32.xlu1 %v841_v38 }
 0x1d0   :  { %v1490_v42 = vpop.f32.mrb[20].mxu0  ;;  %836 = vadd.xlane.f32.xlu0 %v835_v43 }
 0x1d1   :  { %v563_v45 = vadd.f32 %v1490_v42, %v1830_v33  ;;  %v554_v46 = vpop.f32.mrb[21].mxu0 }
 0x1d2   :  { %v555_v47 = vadd.f32 %v1830_v33, %v554_v46  ;;  %v1491_v44 = vpop.f32.mrb[22].mxu0 }
 0x1d3   :  { %v735_v48 = vmax.f32 %v563_v45, 0.0  ;;  %v566_v49 = vadd.f32 %v1491_v44, %v1830_v33  ;;  %v557_v50 = vpop.f32.mrb[23].mxu0 }
 0x1d4   :  { %v733_v27 = vmax.f32 %v555_v47, 0.0  ;;  %v558_v41 = vadd.f32 %v1830_v33, %v557_v50 }
 0x1d5   :  { %v736_v51 = vmax.f32 %v566_v49, 0.0  ;;  %v790_v52 = vmul.f32 %v1837_v36, %v735_v48 }
 0x1d6   :  { %v734_v53 = vmax.f32 %v558_v41, 0.0  ;;  %v788_v57 = vmul.f32 %v1837_v36, %v733_v27 }
 0x1d7   :  { %v850_v54 = vsel %vm431_vm3, %v790_v52, 0.0  ;;  %v791_v56 = vmul.f32 %v1837_v36, %v736_v51 }
 0x1d8   :  { %851 = vadd.xlane.f32.xlu0 %v850_v54  ;;  %v789_v62 = vmul.f32 %v1837_v36, %v734_v53  ;;  %v844_v5 = vsel %vm431_vm3, %v788_v57, 0.0 }
 0x1d9   :  { %v1494_v58 = vpop.f32.mrb[24].mxu0  ;;  %v853_v60 = vsel %vm431_vm3, %v791_v56, 0.0 }
 0x1da   :  { %v579_v0 = vadd.f32 %v1494_v58, %v1830_v33  ;;  %v570_v1 = vpop.f32.mrb[25].mxu0  ;;  %854 = vadd.xlane.f32.xlu1 %v853_v60  ;;  %v847_v32 = vsel %vm431_vm3, %v789_v62, 0.0 }
 0x1db   :  { %v571_v2 = vadd.f32 %v1830_v33, %v570_v1  ;;  %v1495_v4 = vpop.f32.mrb[26].mxu0 }
 0x1dc   :  { %v739_v6 = vmax.f32 %v579_v0, 0.0  ;;  %v582_v10 = vadd.f32 %v1495_v4, %v1830_v33  ;;  %v573_v11 = vpop.f32.mrb[27].mxu0  ;;  %845 = vadd.xlane.f32.xlu0 %v844_v5 }
 0x1dd   :  { %v737_v16 = vmax.f32 %v571_v2, 0.0  ;;  %v574_v18 = vadd.f32 %v1830_v33, %v573_v11 }
 0x1de   :  { %v740_v61 = vmax.f32 %v582_v10, 0.0  ;;  %848 = vadd.xlane.f32.xlu1 %v847_v32  ;;  %v794_v3 = vmul.f32 %v1837_v36, %v739_v6 }
 0x1df   :  { %v738_v20 = vmax.f32 %v574_v18, 0.0  ;;  %v1866_v40 = vpop.f32.mrb[0].mxu1  ;;  %v792_v15 = vmul.f32 %v1837_v36, %v737_v16 }
 0x1e0   :  { %v1868_v59 = vpop.f32.mrb[1].mxu1  ;;  %v862_v7 = vsel %vm431_vm3, %v794_v3, 0.0  ;;  %v795_v34 = vmul.f32 %v1837_v36, %v740_v61 }
 0x1e1   :  { %863 = vadd.xlane.f32.xlu0 %v862_v7  ;;  %v1873_v35 = vpop.f32.mrb[2].mxu1  ;;  %v793_v13 = vmul.f32 %v1837_v36, %v738_v20  ;;  %v856_v14 = vsel %vm431_vm3, %v792_v15, 0.0 }
 0x1e2   :  { %v865_v19 = vsel %vm431_vm3, %v795_v34, 0.0  ;;  %v1876_v9 = vpop.f32.mrb[3].mxu1 }
 0x1e3   :  { %866 = vadd.xlane.f32.xlu1 %v865_v19  ;;  %v859_v17 = vsel %vm431_vm3, %v793_v13, 0.0 }
 0x1e5   :  { %857 = vadd.xlane.f32.xlu0 %v856_v14 }
 0x1e7   :  { %860 = vadd.xlane.f32.xlu1 %v859_v17  ;;  %v1502_v28 = vpop.f32.mrb[4].mxu1 }
 0x1e8   :  { %v611_v39 = vadd.f32 %v1502_v28, %v1830_v33  ;;  %v602_v55 = vpop.f32.mrb[5].mxu1 }
 0x1e9   :  { %v603_v63 = vadd.f32 %v1830_v33, %v602_v55  ;;  %v1503_v8 = vpop.f32.mrb[6].mxu1 }
 0x1ea   :  { %v747_v12 = vmax.f32 %v611_v39, 0.0  ;;  %v614_v21 = vadd.f32 %v1503_v8, %v1830_v33  ;;  %v605_v23 = vpop.f32.mrb[7].mxu1 }
 0x1eb   :  { %v745_v25 = vmax.f32 %v603_v63, 0.0  ;;  %v606_v26 = vadd.f32 %v1830_v33, %v605_v23  ;;  %v587_v63 = vadd.f32 %v1830_v33, %v1868_v59 }
 0x1ec   :  { %v748_v29 = vmax.f32 %v614_v21, 0.0  ;;  %v802_v30 = vmul.f32 %v1837_v36, %v747_v12 }
 0x1ed   :  { %v746_v31 = vmax.f32 %v606_v26, 0.0  ;;  %v800_v42 = vmul.f32 %v1837_v36, %v745_v25 }
 0x1ee   :  { %v886_v37 = vsel %vm431_vm3, %v802_v30, 0.0  ;;  %v803_v38 = vmul.f32 %v1837_v36, %v748_v29  ;;  %v741_v30 = vmax.f32 %v587_v63, 0.0 }
 0x1ef   :  { %v1506_v43 = vpop.f32.mrb[8].mxu1  ;;  %887 = vadd.xlane.f32.xlu0 %v886_v37  ;;  %v801_v44 = vmul.f32 %v1837_v36, %v746_v31  ;;  %v880_v41 = vsel %vm431_vm3, %v800_v42, 0.0 }
 0x1f0   :  { %v627_v45 = vadd.f32 %v1506_v43, %v1830_v33  ;;  %v618_v46 = vpop.f32.mrb[9].mxu1  ;;  %v889_v47 = vsel %vm431_vm3, %v803_v38, 0.0 }
 0x1f1   :  { %v619_v48 = vadd.f32 %v1830_v33, %v618_v46  ;;  %v1507_v49 = vpop.f32.mrb[10].mxu1  ;;  %890 = vadd.xlane.f32.xlu1 %v889_v47  ;;  %v883_v53 = vsel %vm431_vm3, %v801_v44, 0.0  ;;  %v590_v47 = vadd.f32 %v1830_v33, %v1876_v9 }
 0x1f2   :  { %v751_v50 = vmax.f32 %v627_v45, 0.0  ;;  %v621_v27 = vpop.f32.mrb[11].mxu1  ;;  %v630_v52 = vadd.f32 %v1507_v49, %v1830_v33  ;;  %v796_v49 = vmul.f32 %v1837_v36, %v741_v30 }
 0x1f3   :  { %881 = vadd.xlane.f32.xlu0 %v880_v41  ;;  %v749_v51 = vmax.f32 %v619_v48, 0.0  ;;  %v622_v56 = vadd.f32 %v1830_v33, %v621_v27 }
 0x1f4   :  { %v806_v54 = vmul.f32 %v1837_v36, %v751_v50  ;;  %v752_v58 = vmax.f32 %v630_v52, 0.0 }
 0x1f5   :  { %884 = vadd.xlane.f32.xlu1 %v883_v53  ;;  %v804_v1 = vmul.f32 %v1837_v36, %v749_v51  ;;  %v750_v6 = vmax.f32 %v622_v56, 0.0 }
 0x1f6   :  { %v898_v0 = vsel %vm431_vm3, %v806_v54, 0.0  ;;  %v807_v32 = vmul.f32 %v1837_v36, %v752_v58  ;;  %v742_v54 = vmax.f32 %v590_v47, 0.0 }
 0x1f7   :  { %v1510_v57 = vpop.f32.mrb[12].mxu1  ;;  %v892_v16 = vsel %vm431_vm3, %v804_v1, 0.0  ;;  %v805_v13 = vmul.f32 %v1837_v36, %v750_v6 }
 0x1f8   :  { %v643_v60 = vadd.f32 %v1510_v57, %v1830_v33  ;;  %v634_v62 = vpop.f32.mrb[13].mxu1  ;;  %v901_v19 = vsel %vm431_vm3, %v807_v32, 0.0  ;;  %v868_v57 = vsel %vm431_vm3, %v796_v49, 0.0 }
 0x1f9   :  { %v1511_v2 = vpop.f32.mrb[14].mxu1  ;;  %899 = vadd.xlane.f32.xlu1 %v898_v0  ;;  %v635_v11 = vadd.f32 %v1830_v33, %v634_v62  ;;  %v895_v39 = vsel %vm431_vm3, %v805_v13, 0.0  ;;  %v595_v0 = vadd.f32 %v1866_v40, %v1830_v33 }
 0x1fa   :  { %v755_v4 = vmax.f32 %v643_v60, 0.0  ;;  %v637_v5 = vpop.f32.mrb[15].mxu1  ;;  %v646_v8 = vadd.f32 %v1511_v2, %v1830_v33 }
 0x1fb   :  { %v638_v10 = vadd.f32 %v1830_v33, %v637_v5  ;;  %v753_v34 = vmax.f32 %v635_v11, 0.0 }
 0x1fc   :  { %v810_v18 = vmul.f32 %v1837_v36, %v755_v4  ;;  %v756_v42 = vmax.f32 %v646_v8, 0.0  ;;  %v797_v4 = vmul.f32 %v1837_v36, %v742_v54 }
 0x1fd   :  { %v754_v61 = vmax.f32 %v638_v10, 0.0  ;;  %893 = vadd.xlane.f32.xlu1 %v892_v16  ;;  %v808_v55 = vmul.f32 %v1837_v36, %v753_v34  ;;  %v743_v16 = vmax.f32 %v595_v0, 0.0 }
 0x1fe   :  { %v910_v3 = vsel %vm431_vm3, %v810_v18, 0.0  ;;  %v811_v51 = vmul.f32 %v1837_v36, %v756_v42  ;;  %v871_v40 = vsel %vm431_vm3, %v797_v4, 0.0 }
 0x1ff   :  { %v1907_v20 = vpop.f32.mrb[16].mxu1  ;;  %911 = vadd.xlane.f32.xlu0 %v910_v3  ;;  %v809_v7 = vmul.f32 %v1837_v36, %v754_v61  ;;  %v904_v25 = vsel %vm431_vm3, %v808_v55, 0.0  ;;  %v598_v3 = vadd.f32 %v1873_v35, %v1830_v33 }
 0x200   :  { %v650_v15 = vpop.f32.mrb[17].mxu1  ;;  %v913_v60 = vsel %vm431_vm3, %v811_v51, 0.0  ;;  %v659_v18 = vadd.f32 %v1907_v20, %v1830_v33 }
 0x201   :  { %v1515_v14 = vpop.f32.mrb[18].mxu1  ;;  %902 = vadd.xlane.f32.xlu1 %v901_v19  ;;  %v907_v17 = vsel %vm431_vm3, %v809_v7, 0.0  ;;  %v651_v31 = vadd.f32 %v1830_v33, %v650_v15  ;;  %v798_v15 = vmul.f32 %v1837_v36, %v743_v16  ;;  %v744_v20 = vmax.f32 %v598_v3, 0.0 }
 0x202   :  { %v653_v28 = vpop.f32.mrb[19].mxu1  ;;  %v662_v59 = vadd.f32 %v1515_v14, %v1830_v33  ;;  %v759_v7 = vmax.f32 %v659_v18, 0.0 }
 0x203   :  { %908 = vadd.xlane.f32.xlu0 %v907_v17  ;;  %v757_v44 = vmax.f32 %v651_v31, 0.0  ;;  %v654_v56 = vadd.f32 %v1830_v33, %v653_v28  ;;  %v874_v55 = vsel %vm431_vm3, %v798_v15, 0.0 }
 0x204   :  { %v760_v50 = vmax.f32 %v662_v59, 0.0  ;;  %v814_v35 = vmul.f32 %v1837_v36, %v759_v7 }
 0x205   :  { %896 = vadd.xlane.f32.xlu1 %v895_v39  ;;  %v812_v58 = vmul.f32 %v1837_v36, %v757_v44  ;;  %v758_v1 = vmax.f32 %v654_v56, 0.0 }
 0x206   :  { %v815_v62 = vmul.f32 %v1837_v36, %v760_v50 }
 0x207   :  { %v1518_v12 = vpop.f32.mrb[20].mxu1  ;;  %v916_v2 = vsel %vm431_vm3, %v812_v58, 0.0  ;;  %v813_v61 = vmul.f32 %v1837_v36, %v758_v1 }
 0x208   :  { %v675_v21 = vadd.f32 %v1518_v12, %v1830_v33  ;;  %v666_v23 = vpop.f32.mrb[21].mxu1  ;;  %v925_v6 = vsel %vm431_vm3, %v815_v62, 0.0 }
 0x209   :  { %v667_v26 = vadd.f32 %v1830_v33, %v666_v23  ;;  %v1519_v29 = vpop.f32.mrb[22].mxu1  ;;  %905 = vadd.xlane.f32.xlu1 %v904_v25  ;;  %v919_v34 = vsel %vm431_vm3, %v813_v61, 0.0  ;;  %v922_v25 = vsel %vm431_vm3, %v814_v35, 0.0 }
 0x20a   :  { %v763_v37 = vmax.f32 %v675_v21, 0.0  ;;  %v669_v38 = vpop.f32.mrb[23].mxu1  ;;  %v678_v17 = vadd.f32 %v1519_v29, %v1830_v33 }
 0x20b   :  { %v761_v43 = vmax.f32 %v667_v26, 0.0  ;;  %v670_v23 = vadd.f32 %v1830_v33, %v669_v38  ;;  %v799_v26 = vmul.f32 %v1837_v36, %v744_v20 }
 0x20c   :  { %v818_v45 = vmul.f32 %v1837_v36, %v763_v37  ;;  %v764_v21 = vmax.f32 %v678_v17, 0.0 }
 0x20d   :  { %v816_v46 = vmul.f32 %v1837_v36, %v761_v43  ;;  %v762_v37 = vmax.f32 %v670_v23, 0.0  ;;  %v877_v59 = vsel %vm431_vm3, %v799_v26, 0.0 }
 0x20e   :  { %v934_v48 = vsel %vm431_vm3, %v818_v45, 0.0  ;;  %v819_v43 = vmul.f32 %v1837_v36, %v764_v21 }
 0x20f   :  { %v1522_v27 = vpop.f32.mrb[24].mxu1  ;;  %935 = vadd.xlane.f32.xlu0 %v934_v48  ;;  %v928_v41 = vsel %vm431_vm3, %v816_v46, 0.0  ;;  %v817_v44 = vmul.f32 %v1837_v36, %v762_v37 }
 0x210   :  { %v682_v52 = vpop.f32.mrb[25].mxu1  ;;  %929 = vadd.xlane.f32.xlu1 %v928_v41  ;;  %v691_v42 = vadd.f32 %v1522_v27, %v1830_v33  ;;  %v937_v47 = vsel %vm431_vm3, %v819_v43, 0.0 }
 0x211   :  { %v1931_v53 = vpop.f32.mrb[26].mxu1  ;;  %v683_v46 = vadd.f32 %v1830_v33, %v682_v52  ;;  %v931_v50 = vsel %vm431_vm3, %v817_v44, 0.0 }
 0x212   :  { %v1934_v9 = vpop.f32.mrb[27].mxu1  ;;  %v767_v45 = vmax.f32 %v691_v42, 0.0  ;;  %v694_v49 = vadd.f32 %v1931_v53, %v1830_v33 }
 0x213   :  { %869 = vadd.xlane.f32.xlu0 %v868_v57  ;;  %v765_v48 = vmax.f32 %v683_v46, 0.0  ;;  %v686_v51 = vadd.f32 %v1830_v33, %v1934_v9 }
 0x214   :  { %914 = vadd.xlane.f32.xlu1 %v913_v60  ;;  %v822_v27 = vmul.f32 %v1837_v36, %v767_v45  ;;  %v768_v41 = vmax.f32 %v694_v49, 0.0 }
 0x215   :  { %v820_v54 = vmul.f32 %v1837_v36, %v765_v48  ;;  %v766_v56 = vmax.f32 %v686_v51, 0.0 }
 0x216   :  { %v946_v52 = vsel %vm431_vm3, %v822_v27, 0.0  ;;  %v823_v53 = vmul.f32 %v1837_v36, %v768_v41 }
 0x217   :  { %v1526_v5 = vpop.f32.mrb[28].mxu1  ;;  %917 = vadd.xlane.f32.xlu0 %v916_v2  ;;  %v940_v58 = vsel %vm431_vm3, %v820_v54, 0.0  ;;  %v821_v9 = vmul.f32 %v1837_v36, %v766_v56 }
 0x218   :  { %v1945_v10 = vpop.f32.mrb[29].mxu1  ;;  %926 = vadd.xlane.f32.xlu1 %v925_v6  ;;  %v707_v57 = vadd.f32 %v1526_v5, %v1830_v33  ;;  %v949_v0 = vsel %vm431_vm3, %v823_v53, 0.0 }
 0x219   :  { %v1947_v11 = vpop.f32.mrb[30].mxu1  ;;  %v699_v62 = vadd.f32 %v1830_v33, %v1945_v10  ;;  %v943_v4 = vsel %vm431_vm3, %v821_v9, 0.0 }
 0x21a   :  { %v1951_v32 = vpop.f32.mrb[31].mxu1  ;;  %v771_v60 = vmax.f32 %v707_v57, 0.0  ;;  %v710_v2 = vadd.f32 %v1947_v11, %v1830_v33 }
 0x21b   :  { %872 = vadd.xlane.f32.xlu0 %v871_v40  ;;  %v769_v1 = vmax.f32 %v699_v62, 0.0  ;;  %v702_v16 = vadd.f32 %v1830_v33, %v1951_v32 }
 0x21c   :  { %v826_v5 = vmul.f32 %v1837_v36, %v771_v60  ;;  %v772_v6 = vmax.f32 %v710_v2, 0.0 }
 0x21d   :  { %v824_v18 = vmul.f32 %v1837_v36, %v769_v1  ;;  %v770_v40 = vmax.f32 %v702_v16, 0.0 }
 0x21e   :  { %v958_v10 = vsel %vm431_vm3, %v826_v5, 0.0  ;;  %v827_v3 = vmul.f32 %v1837_v36, %v772_v6 }
 0x21f   :  { %v1959_v19 = vpop.f32.mrb[32].mxu1  ;;  %920 = vadd.xlane.f32.xlu0 %v919_v34  ;;  %v952_v11 = vsel %vm431_vm3, %v824_v18, 0.0  ;;  %v825_v15 = vmul.f32 %v1837_v36, %v770_v40 }
 0x220   :  { %v1961_v13 = vpop.f32.mrb[33].mxu1  ;;  %v723_v7 = vadd.f32 %v1959_v19, %v1830_v33  ;;  %v961_v32 = vsel %vm431_vm3, %v827_v3, 0.0 }
 0x221   :  { %v1531_v14 = vpop.f32.mrb[34].mxu1  ;;  %v715_v61 = vadd.f32 %v1830_v33, %v1961_v13 }
 0x222   :  { %v726_v28 = vadd.f32 %v1531_v14, %v1830_v33  ;;  %v717_v39 = vpop.f32.mrb[35].mxu1  ;;  %v775_v20 = vmax.f32 %v723_v7, 0.0  ;;  %v955_v14 = vsel %vm431_vm3, %v825_v15, 0.0 }
 0x223   :  { %v718_v63 = vadd.f32 %v1830_v33, %v717_v39  ;;  %875 = vadd.xlane.f32.xlu0 %v874_v55  ;;  %v773_v34 = vmax.f32 %v715_v61, 0.0  ;;  %v2016_v39 = vpop.permute.xlu1 %983  ;;  %v2019_v33 = vand.u32 127, %v261_v22 }
 0x224   :  { %v776_v8 = vmax.f32 %v726_v28, 0.0  ;;  %v830_v28 = vmul.f32 %v1837_v36, %v775_v20 }
 0x225   :  { %v774_v12 = vmax.f32 %v718_v63, 0.0  ;;  %v828_v17 = vmul.f32 %v1837_v36, %v773_v34  ;;  %v1088_v19 = vadd.s32 4294967288, %v2019_v33  ;;  %v1095_v23 = vadd.s32 4294967280, %v2019_v33 }
 0x226   :  { %v831_v31 = vmul.f32 %v1837_v36, %v776_v8  ;;  %v970_v55 = vsel %vm431_vm3, %v830_v28, 0.0  ;;  %v2025_v8 = vsub.s32 %v2019_v33, %v1679_v24  ;;  %v1144_v5 = vadd.s32 4294967224, %v2019_v33 }
 0x227   :  { %923 = vadd.xlane.f32.xlu0 %v922_v25  ;;  %v829_v29 = vmul.f32 %v1837_v36, %v774_v12  ;;  %v964_v13 = vsel %vm431_vm3, %v828_v17, 0.0  ;;  %v2029_v36 = vsub.s32 %v1088_v19, %v1679_v24  ;;  %v2038_v37 = vsub.s32 %v1095_v23, %v1679_v24 }
 0x228   :  { %v973_v38 = vsel %vm431_vm3, %v831_v31, 0.0  ;;  %v1151_v18 = vadd.s32 4294967216, %v2019_v33  ;;  %v2085_v34 = vsub.s32 %v1144_v5, %v1679_v24 }
 0x229   :  { %v967_v30 = vsel %vm431_vm3, %v829_v29, 0.0  ;;  %v1102_v29 = vadd.s32 4294967272, %v2019_v33  ;;  %vm1351_vm3 = vcmask 1041409  }
 0x22a   :  { %968 = vadd.xlane.f32.xlu1 %v967_v30  ;;  %v2089_v15 = vsub.s32 %v1151_v18, %v1679_v24 }
 0x22b   :  { %878 = vadd.xlane.f32.xlu0 %v877_v59  ;;  %v1109_v59 = vadd.s32 4294967264, %v2019_v33  ;;  %v2044_v45 = vsub.s32 %v1102_v29, %v1679_v24 }
 0x22d   :  { %v2050_v49 = vsub.s32 %v1109_v59, %v1679_v24 }
 0x22e   :  { %974 = vadd.xlane.f32.xlu1 %v973_v38  ;;  %v1116_v38 = vadd.s32 4294967256, %v2019_v33 }
 0x22f   :  { %938 = vadd.xlane.f32.xlu0 %v937_v47  ;;  %v1123_v47 = vadd.s32 4294967248, %v2019_v33 }
 0x230   :  { %v2055_v51 = vsub.s32 %v1116_v38, %v1679_v24 }
 0x231   :  { %v2059_v54 = vsub.s32 %v1123_v47, %v1679_v24 }
 0x233   :  { %932 = vadd.xlane.f32.xlu0 %v931_v50 }
 0x237   :  { %947 = vadd.xlane.f32.xlu0 %v946_v52 }
 0x23b   :  { %941 = vadd.xlane.f32.xlu0 %v940_v58  ;;  %v1130_v58 = vadd.s32 4294967240, %v2019_v33 }
 0x23d   :  { %v2072_v6 = vsub.s32 %v1130_v58, %v1679_v24 }
 0x23f   :  { %950 = vadd.xlane.f32.xlu0 %v949_v0  ;;  %v1137_v0 = vadd.s32 4294967232, %v2019_v33 }
 0x243   :  { %944 = vadd.xlane.f32.xlu0 %v943_v4 }
 0x247   :  { %959 = vadd.xlane.f32.xlu0 %v958_v10 }
 0x24b   :  { %953 = vadd.xlane.f32.xlu0 %v952_v11  ;;  %v2081_v11 = vsub.s32 %v1137_v0, %v1679_v24 }
 0x24f   :  { %962 = vadd.xlane.f32.xlu0 %v961_v32 }
 0x253   :  { %956 = vadd.xlane.f32.xlu0 %v955_v14 }
 0x257   :  { %965 = vadd.xlane.f32.xlu0 %v964_v13 }
 0x258   :  { %v840_v63 = vpop.xlane.xlu1 %839 }
 0x259   :  { %v834_v35 = vpop.xlane.xlu0 %833  ;;  %v988_v42 = vadd.f32 %v2016_v39, %v840_v63 }
 0x25a   :  { %v986_v12 = vadd.f32 %v2016_v39, %v834_v35 }
 0x25b   :  { %971 = vadd.xlane.f32.xlu0 %v970_v55  ;;  %v1099_v48 = vrot.slane %v988_v42, %v2038_v37 }
 0x25c   :  { %v1087_v25 = vrot.slane %v986_v12, %v2025_v8  ;;  %v843_v30 = vpop.xlane.xlu1 %842 }
 0x25d   :  { %v837_v21 = vpop.xlane.xlu0 %836  ;;  %v989_v46 = vadd.f32 %v2016_v39, %v843_v30 }
 0x25e   :  { %v987_v22 = vadd.f32 %v2016_v39, %v837_v21 }
 0x25f   :  { %v1106_v52 = vrot.slane %v989_v46, %v2044_v45 }
 0x260   :  { %v1092_v26 = vrot.slane %v987_v22, %v2029_v36 }
 0x262   :  { %v1094_v31 = vsel %vm1093_vm4, %v1092_v26, %v1087_v25 }
 0x263   :  { %v1101_v27 = vsel %vm1100_vm5, %v1099_v48, %v1094_v31 }
 0x264   :  { %v1108_v62 = vsel %vm1107_vm6, %v1106_v52, %v1101_v27 }
 0x265   :  { %v852_v43 = vpop.xlane.xlu0 %851 }
 0x266   :  { %v992_v56 = vadd.f32 %v2016_v39, %v852_v43 }
 0x267   :  { %v855_v44 = vpop.xlane.xlu1 %854 }
 0x268   :  { %v1127_v4 = vrot.slane %v992_v56, %v2059_v54  ;;  %v993_v16 = vadd.f32 %v2016_v39, %v855_v44 }
 0x269   :  { %v846_v50 = vpop.xlane.xlu0 %845 }
 0x26a   :  { %v990_v41 = vadd.f32 %v2016_v39, %v846_v50  ;;  %v1134_v32 = vrot.slane %v993_v16, %v2072_v6 }
 0x26b   :  { %v849_v57 = vpop.xlane.xlu1 %848 }
 0x26c   :  { %v1113_v53 = vrot.slane %v990_v41, %v2050_v49  ;;  %v991_v60 = vadd.f32 %v2016_v39, %v849_v57 }
 0x26e   :  { %v1115_v9 = vsel %vm1114_vm7, %v1113_v53, %v1108_v62  ;;  %v1120_v1 = vrot.slane %v991_v60, %v2055_v51  ;;  %v864_v2 = vpop.xlane.xlu0 %863 }
 0x26f   :  { %v996_v20 = vadd.f32 %v2016_v39, %v864_v2 }
 0x270   :  { %v1122_v10 = vsel %vm1121_vm8, %v1120_v1, %v1115_v9  ;;  %v2077_v40 = vpop.xlane.xlu1 %866 }
 0x271   :  { %v1129_v61 = vsel %vm1128_vm9, %v1127_v4, %v1122_v10  ;;  %v1155_v35 = vrot.slane %v996_v20, %v2089_v15 }
 0x272   :  { %v858_v3 = vpop.xlane.xlu0 %857  ;;  %v1136_v28 = vsel %vm1135_vm10, %v1134_v32, %v1129_v61  ;;  %v1158_v32 = vadd.s32 4294967208, %v2019_v33 }
 0x273   :  { %v994_v7 = vadd.f32 %v2016_v39, %v858_v3 }
 0x274   :  { %v861_v14 = vpop.xlane.xlu1 %860 }
 0x275   :  { %v1141_v17 = vrot.slane %v994_v7, %v2081_v11  ;;  %v995_v13 = vadd.f32 %v2016_v39, %v861_v14 }
 0x277   :  { %v1143_v19 = vsel %vm1142_vm11, %v1141_v17, %v1136_v28  ;;  %v1148_v55 = vrot.slane %v995_v13, %v2085_v34  ;;  %v1165_v13 = vadd.s32 4294967200, %v2019_v33 }
 0x279   :  { %v1150_v63 = vsel %vm1149_vm12, %v1148_v55, %v1143_v19 }
 0x27a   :  { %v1157_v12 = vsel %vm1156_vm13, %v1155_v35, %v1150_v63  ;;  %v2137_v63 = vsub.s32 %v1158_v32, %v1679_v24 }
 0x27c   :  { %v888_v21 = vpop.xlane.xlu0 %887 }
 0x27d   :  { %v1004_v26 = vadd.f32 %v2016_v39, %v888_v21  ;;  %v997_v21 = vadd.f32 %v2016_v39, %v2077_v40 }
 0x27e   :  { %v891_v22 = vpop.xlane.xlu1 %890 }
 0x27f   :  { %v1205_v59 = vrot.slane %v1004_v26, %v2038_v37  ;;  %v1005_v27 = vadd.f32 %v2016_v39, %v891_v22  ;;  %v2142_v22 = vsub.s32 %v1165_v13, %v1679_v24 }
 0x280   :  { %v882_v23 = vpop.xlane.xlu0 %881 }
 0x281   :  { %v1002_v25 = vadd.f32 %v2016_v39, %v882_v23  ;;  %v1210_v57 = vrot.slane %v1005_v27, %v2044_v45  ;;  %v1172_v27 = vadd.s32 4294967192, %v2019_v33 }
 0x282   :  { %v885_v29 = vpop.xlane.xlu1 %884 }
 0x283   :  { %v1003_v30 = vadd.f32 %v2016_v39, %v885_v29  ;;  %v1196_v31 = vrot.slane %v1002_v25, %v2025_v8  ;;  %v1162_v29 = vrot.slane %v997_v21, %v2137_v63 }
 0x285   :  { %v1200_v42 = vrot.slane %v1003_v30, %v2029_v36 }
 0x286   :  { %v900_v43 = vpop.xlane.xlu1 %899 }
 0x287   :  { %v1201_v38 = vsel %vm1093_vm4, %v1200_v42, %v1196_v31  ;;  %v1008_v41 = vadd.f32 %v2016_v39, %v900_v43  ;;  %v1164_v42 = vsel %vm1163_vm14, %v1162_v29, %v1157_v12 }
 0x288   :  { %v1206_v46 = vsel %vm1100_vm5, %v1205_v59, %v1201_v38 }
 0x289   :  { %v1211_v62 = vsel %vm1107_vm6, %v1210_v57, %v1206_v46  ;;  %v1225_v9 = vrot.slane %v1008_v41, %v2059_v54  ;;  %v1179_v41 = vadd.s32 4294967184, %v2019_v33  ;;  %v2160_v57 = vsub.s32 %v1172_v27, %v1679_v24 }
 0x28a   :  { %v894_v47 = vpop.xlane.xlu1 %893 }
 0x28b   :  { %v1006_v48 = vadd.f32 %v2016_v39, %v894_v47 }
 0x28c   :  { %v912_v44 = vpop.xlane.xlu0 %911 }
 0x28d   :  { %v1215_v52 = vrot.slane %v1006_v48, %v2050_v49  ;;  %v1012_v5 = vadd.f32 %v2016_v39, %v912_v44 }
 0x28e   :  { %v903_v50 = vpop.xlane.xlu1 %902 }
 0x28f   :  { %v1009_v58 = vadd.f32 %v2016_v39, %v903_v50  ;;  %v1216_v1 = vsel %vm1114_vm7, %v1215_v52, %v1211_v62  ;;  %v1245_v14 = vrot.slane %v1012_v5, %v2089_v15 }
 0x290   :  { %v909_v53 = vpop.xlane.xlu0 %908 }
 0x291   :  { %v1011_v2 = vadd.f32 %v2016_v39, %v909_v53  ;;  %v1230_v16 = vrot.slane %v1009_v58, %v2072_v6 }
 0x292   :  { %v897_v56 = vpop.xlane.xlu1 %896 }
 0x293   :  { %v1007_v60 = vadd.f32 %v2016_v39, %v897_v56  ;;  %v1240_v20 = vrot.slane %v1011_v2, %v2085_v34  ;;  %v1186_v56 = vadd.s32 4294967176, %v2019_v33 }
 0x295   :  { %v1220_v0 = vrot.slane %v1007_v60, %v2055_v51  ;;  %v2164_v60 = vsub.s32 %v1179_v41, %v1679_v24  ;;  %v2170_v2 = vsub.s32 %v1186_v56, %v1679_v24 }
 0x296   :  { %v906_v4 = vpop.xlane.xlu1 %905 }
 0x297   :  { %v1221_v10 = vsel %vm1121_vm8, %v1220_v0, %v1216_v1  ;;  %v1010_v18 = vadd.f32 %v2016_v39, %v906_v4 }
 0x298   :  { %v1226_v61 = vsel %vm1128_vm9, %v1225_v9, %v1221_v10 }
 0x299   :  { %v1231_v3 = vsel %vm1135_vm10, %v1230_v16, %v1226_v61  ;;  %v1235_v7 = vrot.slane %v1010_v18, %v2081_v11 }
 0x29b   :  { %v1236_v17 = vsel %vm1142_vm11, %v1235_v7, %v1231_v3 }
 0x29c   :  { %v1241_v28 = vsel %vm1149_vm12, %v1240_v20, %v1236_v17  ;;  %v2133_v19 = vpop.xlane.xlu0 %935 }
 0x29d   :  { %v930_v55 = vpop.xlane.xlu1 %929  ;;  %v1246_v35 = vsel %vm1156_vm13, %v1245_v14, %v1241_v28 }
 0x29e   :  { %v1018_v29 = vadd.f32 %v2016_v39, %v930_v55 }
 0x2a0   :  { %v870_v23 = vpop.xlane.xlu0 %869 }
 0x2a1   :  { %v998_v25 = vadd.f32 %v2016_v39, %v870_v23  ;;  %v915_v26 = vpop.xlane.xlu1 %914 }
 0x2a2   :  { %v1013_v30 = vadd.f32 %v2016_v39, %v915_v26 }
 0x2a3   :  { %v1169_v31 = vrot.slane %v998_v25, %v2142_v22 }
 0x2a4   :  { %v1250_v59 = vrot.slane %v1013_v30, %v2137_v63  ;;  %v918_v40 = vpop.xlane.xlu0 %917 }
 0x2a5   :  { %v1171_v43 = vsel %vm1170_vm15, %v1169_v31, %v1164_v42  ;;  %v1014_v38 = vadd.f32 %v2016_v39, %v918_v40  ;;  %v927_v53 = vpop.xlane.xlu1 %926  ;;  %v1020_v42 = vadd.f32 %v2016_v39, %v2133_v19 }
 0x2a6   :  { %v1251_v47 = vsel %vm1163_vm14, %v1250_v59, %v1246_v35  ;;  %v1017_v33 = vadd.f32 %v2016_v39, %v927_v53  ;;  %v1275_v59 = vrot.slane %v1018_v29, %v2025_v8 }
 0x2a7   :  { %v1255_v46 = vrot.slane %v1014_v38, %v2142_v22 }
 0x2a8   :  { %v873_v44 = vpop.xlane.xlu0 %872  ;;  %v1270_v24 = vrot.slane %v1017_v33, %v2170_v2 }
 0x2a9   :  { %v1256_v48 = vsel %vm1170_vm15, %v1255_v46, %v1251_v47  ;;  %v999_v58 = vadd.f32 %v2016_v39, %v873_v44  ;;  %v1284_v44 = vrot.slane %v1020_v42, %v2038_v37 }
 0x2ab   :  { %v1176_v4 = vrot.slane %v999_v58, %v2160_v57 }
 0x2ac   :  { %v921_v50 = vpop.xlane.xlu0 %920 }
 0x2ad   :  { %v1015_v52 = vadd.f32 %v2016_v39, %v921_v50  ;;  %v1178_v7 = vsel %vm1177_vm0, %v1176_v4, %v1171_v43 }
 0x2af   :  { %v1260_v9 = vrot.slane %v1015_v52, %v2160_v57 }
 0x2b0   :  { %v876_v12 = vpop.xlane.xlu0 %875 }
 0x2b1   :  { %v1000_v62 = vadd.f32 %v2016_v39, %v876_v12  ;;  %v1261_v18 = vsel %vm1177_vm0, %v1260_v9, %v1256_v48 }
 0x2b3   :  { %v1183_v16 = vrot.slane %v1000_v62, %v2164_v60 }
 0x2b4   :  { %v924_v0 = vpop.xlane.xlu0 %923 }
 0x2b5   :  { %v1016_v1 = vadd.f32 %v2016_v39, %v924_v0  ;;  %v1185_v20 = vsel %vm1184_vm1, %v1183_v16, %v1178_v7 }
 0x2b7   :  { %v1265_v5 = vrot.slane %v1016_v1, %v2164_v60  ;;  %v969_v58 = vpop.xlane.xlu1 %968 }
 0x2b8   :  { %v879_v10 = vpop.xlane.xlu0 %878 }
 0x2b9   :  { %v1001_v61 = vadd.f32 %v2016_v39, %v879_v10  ;;  %v1266_v3 = vsel %vm1184_vm1, %v1265_v5, %v1261_v18 }
 0x2ba   :  { %v1271_v13 = vsel %vm1191_vm2, %v1270_v24, %v1266_v3 }
 0x2bb   :  { %v1190_v32 = vrot.slane %v1001_v61, %v2170_v2  ;;  %v975_v10 = vpop.xlane.xlu1 %974  ;;  %v1031_v61 = vadd.f32 %v2016_v39, %v969_v58 }
 0x2bc   :  { %v939_v14 = vpop.xlane.xlu0 %938 }
 0x2bd   :  { %v1192_v17 = vsel %vm1191_vm2, %v1190_v32, %v1185_v20  ;;  %v1021_v38 = vadd.f32 %v2016_v39, %v939_v14 }
 0x2be   :  { %v2185_v28 = vsel %vm1351_vm3, %v1271_v13, %v1192_v17 }
 0x2bf   :  { %v1289_v19 = vrot.slane %v1021_v38, %v2044_v45 }
 0x2c0   :  { %v933_v35 = vpop.xlane.xlu0 %932 }
 0x2c1   :  { %v1019_v26 = vadd.f32 %v2016_v39, %v933_v35 }
 0x2c3   :  { %v1279_v31 = vrot.slane %v1019_v26, %v2029_v36 }
 0x2c4   :  { %v948_v21 = vpop.xlane.xlu0 %947 }
 0x2c5   :  { %v1280_v46 = vsel %vm1093_vm4, %v1279_v31, %v1275_v59  ;;  %v1024_v50 = vadd.f32 %v2016_v39, %v948_v21  ;;  %vm1353_vm4 = vcmask 1042434  }
 0x2c6   :  { %v1285_v55 = vsel %vm1100_vm5, %v1284_v44, %v1280_v46 }
 0x2c7   :  { %v1290_v27 = vsel %vm1107_vm6, %v1289_v19, %v1285_v55 }
 0x2c8   :  { %v942_v23 = vpop.xlane.xlu0 %941 }
 0x2c9   :  { %v1022_v40 = vadd.f32 %v2016_v39, %v942_v23 }
 0x2cb   :  { %v1294_v36 = vrot.slane %v1022_v40, %v2050_v49  ;;  %v1304_v49 = vrot.slane %v1024_v50, %v2059_v54 }
 0x2cc   :  { %v951_v25 = vpop.xlane.xlu0 %950 }
 0x2cd   :  { %v1295_v41 = vsel %vm1114_vm7, %v1294_v36, %v1290_v27  ;;  %v1025_v37 = vadd.f32 %v2016_v39, %v951_v25 }
 0x2cf   :  { %v1309_v0 = vrot.slane %v1025_v37, %v2072_v6 }
 0x2d0   :  { %v945_v30 = vpop.xlane.xlu0 %944 }
 0x2d1   :  { %v1023_v47 = vadd.f32 %v2016_v39, %v945_v30 }
 0x2d3   :  { %v1299_v8 = vrot.slane %v1023_v47, %v2055_v51 }
 0x2d4   :  { %v960_v43 = vpop.xlane.xlu0 %959 }
 0x2d5   :  { %v1300_v56 = vsel %vm1121_vm8, %v1299_v8, %v1295_v41  ;;  %v1028_v51 = vadd.f32 %v2016_v39, %v960_v43 }
 0x2d6   :  { %v1305_v45 = vsel %vm1128_vm9, %v1304_v49, %v1300_v56 }
 0x2d7   :  { %v1310_v33 = vsel %vm1135_vm10, %v1309_v0, %v1305_v45  ;;  %v1324_v54 = vrot.slane %v1028_v51, %v2089_v15  ;;  %v1033_v15 = vadd.f32 %v2016_v39, %v975_v10 }
 0x2d8   :  { %v954_v48 = vpop.xlane.xlu0 %953 }
 0x2d9   :  { %v1026_v12 = vadd.f32 %v2016_v39, %v954_v48  ;;  %v1349_v17 = vrot.slane %v1033_v15, %v2170_v2 }
 0x2db   :  { %v1314_v53 = vrot.slane %v1026_v12, %v2081_v11 }
 0x2dc   :  { %v963_v52 = vpop.xlane.xlu0 %962 }
 0x2dd   :  { %v1029_v9 = vadd.f32 %v2016_v39, %v963_v52  ;;  %v1315_v5 = vsel %vm1142_vm11, %v1314_v53, %v1310_v33 }
 0x2df   :  { %v1329_v18 = vrot.slane %v1029_v9, %v2137_v63  ;;  %v1339_v63 = vrot.slane %v1031_v61, %v2160_v57 }
 0x2e0   :  { %v957_v62 = vpop.xlane.xlu0 %956 }
 0x2e1   :  { %v1027_v1 = vadd.f32 %v2016_v39, %v957_v62 }
 0x2e3   :  { %v1319_v4 = vrot.slane %v1027_v1, %v2085_v34 }
 0x2e4   :  { %v966_v16 = vpop.xlane.xlu0 %965 }
 0x2e5   :  { %v1320_v11 = vsel %vm1149_vm12, %v1319_v4, %v1315_v5  ;;  %v1030_v6 = vadd.f32 %v2016_v39, %v966_v16 }
 0x2e6   :  { %v1325_v3 = vsel %vm1156_vm13, %v1324_v54, %v1320_v11 }
 0x2e7   :  { %v1330_v24 = vsel %vm1163_vm14, %v1329_v18, %v1325_v3  ;;  %v1334_v34 = vrot.slane %v1030_v6, %v2142_v22 }
 0x2e8   :  { %v972_v7 = vpop.xlane.xlu0 %971 }
 0x2e9   :  { %v1335_v32 = vsel %vm1170_vm15, %v1334_v34, %v1330_v24  ;;  %v1032_v20 = vadd.f32 %v2016_v39, %v972_v7 }
 0x2ea   :  { %v1340_v13 = vsel %vm1177_vm0, %v1339_v63, %v1335_v32 }
 0x2eb   :  { %v1344_v14 = vrot.slane %v1032_v20, %v2164_v60 }
 0x2ed   :  { %v1345_v22 = vsel %vm1184_vm1, %v1344_v14, %v1340_v13 }
 0x2ee   :  { %v1350_v35 = vsel %vm1191_vm2, %v1349_v17, %v1345_v22 }
 0x2ef   :  { %v1354_v21 = vsel %vm1353_vm4, %v1350_v35, %v2185_v28 }
 0x2f0   :  { %1356 = vst [vmem:[#allocation3] sm:$0x7] %v1354_v21 }
 0x2f1   :  { %1566 = shalt.err (!%p1563_p4)
}
 0x2f2   :  { %s1567_s15 = scalar_lea.hbm %s2256_s8, 64 }
 0x2f3   :  { %p1568_p5 = scmp.ne.s32.totalorder %s2256_s8, %s1567_s15  ;;  %p1571_p6 = scmp.lt.u32.totalorder %s1567_s15, %s2256_s8 }
 0x2f5   :  { %p1573_p7 = pnand %p1571_p6, %p1568_p5 }
 0x2f7   :  { %1576 = shalt.err (!%p1573_p7)
}
 0x2f8   :  { %1366 = dma.vmem_to_hbm [thread:$0]  %s1364_s6, 64, %s2256_s8, [#allocation4]  }
 0x2f9   :  { %1577 = dma.done.wait [#allocation4], 64  }
 0x2fa   :  { %1578 = vsyncadd [#allocation4], 4294967232 }
 0x2fb   :  { %1370 = vsyncpa [#allocation4], 1 }

</bundles_post_ra>
